<compile_context>
chip_gen: v7x
topology: tpu7x:2x2x1
jax: 0.10.0
libtpu: 0.0.40
codegen_flags: <defaults>
</compile_context>

<pallas_src>
import jax
import jax.numpy as jnp
from jax import lax
from jax.experimental import pallas as pl
from jax.experimental.pallas import tpu as pltpu


def _loss_from_rows(x):
    """Closed-form loss for one [N, D] group of f32 rows (traced in-kernel)."""
    n = x.shape[0]

    # Row-wise squared norms on the ORIGINAL rows -> max norm (one EUP rsqrt).
    sq_row = jnp.sum(x * x, axis=1, keepdims=True)            # [N, 1]
    max_sq = jnp.max(sq_row)

    # Centered form: exact for pairwise distances, numerically stable.
    col_mean = jnp.sum(x, axis=0, keepdims=True) * jnp.float32(1.0 / n)  # [1, D]
    xc = x - col_mean
    masked_sum = jnp.float32(n) * jnp.sum(xc * xc)
    masked_sum = jnp.maximum(masked_sum, jnp.float32(0.0))     # round-off guard

    count = n * (n - 1) // 2                                   # trace-time const
    inv_count = jnp.float32(1.0 / count)
    return masked_sum * lax.rsqrt(max_sq) * inv_count


def _norm_dist_loss_kernel(x_ref, o_ref):
    # x_ref: [N, D] whole array in VMEM; o_ref: [1, 1] scalar in SMEM.
    x = x_ref[...].astype(jnp.float32)   # in-kernel upcast (bf16-safe on all gens)
    o_ref[0, 0] = _loss_from_rows(x)


def _norm_dist_loss_batched_kernel(x_ref, o_ref):
    # x_ref: [1, N, D] block (one group per grid step); o_ref: [1, 1] in SMEM.
    x = x_ref[0].astype(jnp.float32)
    o_ref[0, 0] = _loss_from_rows(x)


def normalized_distance_loss(x):
    """Pallas TPU NormalizedDistanceLoss.forward for a single [N, D] input.

    Accepts f32 or bf16; returns a scalar f32 loss.
    """
    n, d = x.shape
    assert n >= 2, "NormalizedDistanceLoss needs at least 2 rows"
    out = pl.pallas_call(
        _norm_dist_loss_kernel,
        out_shape=jax.ShapeDtypeStruct((1, 1), jnp.float32),
        # Whole-array VMEM spec: single grid point => nothing to pipeline, so
        # skip the blocked-spec DMA/double-buffer machinery entirely.
        in_specs=[pl.BlockSpec(memory_space=pltpu.MemorySpace.VMEM)],
        # Scalar result in SMEM: no lane-sparse masked vector store.
        out_specs=pl.BlockSpec(memory_space=pltpu.MemorySpace.SMEM),
    )(x)
    return out[0, 0]


def normalized_distance_loss_batched(xb):
    """Batched variant: xb is [B, N, D]; returns [B] f32 losses.

    One pallas_call over all groups amortizes launch / per-step overhead, and
    the "parallel" batch axis lets v7x's two TensorCores split the work.
    """
    b, n, d = xb.shape
    assert n >= 2, "NormalizedDistanceLoss needs at least 2 rows"
    out = pl.pallas_call(
        _norm_dist_loss_batched_kernel,
        out_shape=jax.ShapeDtypeStruct((b, 1), jnp.float32),
        grid=(b,),
        # Block (1, N, D): last two dims equal the full array dims, so the
        # (8,128) tiling rule is satisfied regardless of N, D.
        in_specs=[pl.BlockSpec((1, n, d), lambda i: (i, 0, 0))],
        out_specs=pl.BlockSpec((1, 1), lambda i: (i, 0),
                               memory_space=pltpu.MemorySpace.SMEM),
        compiler_params=pltpu.CompilerParams(
            dimension_semantics=("parallel",)),
    )(xb)
    return out[:, 0]
    # TODO(synk): for very large N, switch to a row-tiled grid (reduction axis
    # "arbitrary", SMEM/VMEM accumulators, tm sized against v7x's 32 MiB scoped
    # VMEM) so the kernel stays a single HBM-bandwidth-bound streaming pass.


def _reference(x):
    # Pure-JAX reference matching the PyTorch module semantics exactly.
    x = x.astype(jnp.float32)
    n = x.shape[0]
    g = x @ x.T
    sq = jnp.sum(x * x, axis=1)
    dist = -2.0 * g + sq[None, :] + sq[:, None]
    mask = jnp.triu(jnp.ones((n, n), dtype=bool), k=1)
    vals = dist[mask]
    norm = jnp.max(jnp.linalg.norm(x, axis=1))
    return jnp.mean(vals / norm)


if __name__ == "__main__":
    key = jax.random.PRNGKey(0)
    N, D = 8, 32  # small [N, D] embedding batch, consistent with the module
    x = jax.random.normal(key, (N, D), dtype=jnp.float32)

    # Single-group path.
    loss = jax.block_until_ready(normalized_distance_loss(x))
    ref = jax.block_until_ready(_reference(x))
    assert jnp.allclose(loss, ref, rtol=1e-5, atol=1e-5), (loss, ref)

    # Batched path (B independent loss evaluations in one pallas_call).
    B = 4
    xb = jax.random.normal(jax.random.PRNGKey(1), (B, N, D), dtype=jnp.float32)
    losses = jax.block_until_ready(normalized_distance_loss_batched(xb))
    refs = jax.block_until_ready(jax.vmap(_reference)(xb))
    assert jnp.allclose(losses, refs, rtol=1e-5, atol=1e-5), (losses, refs)

    # Mild common offset: exercises the centered (cancellation-free) form.
    x_off = x + 10.0
    loss_off = jax.block_until_ready(normalized_distance_loss(x_off))
    ref_off = jax.block_until_ready(_reference(x_off))
    assert jnp.allclose(loss_off, ref_off, rtol=1e-4, atol=1e-4), (loss_off, ref_off)

    print("KERNEL_OK")
</pallas_src>

<mosaic_0001>
module attributes {stable_mosaic.version = 11 : i64} {
  func.func @_norm_dist_loss_kernel(%arg0: memref<8x32xf32, #tpu.memory_space<vmem>>, %arg1: memref<1x1xf32, #tpu.memory_space<smem>>) attributes {dimension_semantics = [], scalar_prefetch = 0 : i64, scratch_operands = 0 : i64, tpu.core_type = #tpu.core_type<tc>} {
    %c0 = arith.constant 0 : index
    %c0_0 = arith.constant 0 : index
    %0 = vector.load %arg0[%c0, %c0_0] : memref<8x32xf32, #tpu.memory_space<vmem>>, vector<8x32xf32>
    %1 = arith.mulf %0, %0 : vector<8x32xf32>
    %cst = arith.constant dense<0.000000e+00> : vector<8xf32>
    %2 = vector.multi_reduction <add>, %1, %cst [1] : vector<8x32xf32> to vector<8xf32>
    %3 = vector.shape_cast %2 : vector<8xf32> to vector<8x1xf32>
    %4 = vector.shape_cast %3 : vector<8x1xf32> to vector<1x8x1xf32>
    %cst_1 = arith.constant dense<0xFF800000> : vector<1xf32>
    %5 = vector.multi_reduction <maximumf>, %4, %cst_1 [1, 2] : vector<1x8x1xf32> to vector<1xf32>
    %6 = vector.shape_cast %5 : vector<1xf32> to vector<1x1x1xf32>
    %7 = vector.extract %6[0, 0, 0] : f32 from vector<1x1x1xf32>
    %cst_2 = arith.constant dense<0.000000e+00> : vector<32xf32>
    %8 = vector.multi_reduction <add>, %0, %cst_2 [0] : vector<8x32xf32> to vector<32xf32>
    %9 = vector.shape_cast %8 : vector<32xf32> to vector<1x32xf32>
    %cst_3 = arith.constant 1.250000e-01 : f32
    %10 = vector.broadcast %cst_3 : f32 to vector<1x32xf32>
    %11 = arith.mulf %9, %10 : vector<1x32xf32>
    %12 = vector.broadcast %11 : vector<1x32xf32> to vector<8x32xf32>
    %13 = arith.subf %0, %12 : vector<8x32xf32>
    %14 = arith.mulf %13, %13 : vector<8x32xf32>
    %15 = vector.shape_cast %14 : vector<8x32xf32> to vector<1x8x32xf32>
    %cst_4 = arith.constant dense<0.000000e+00> : vector<1xf32>
    %16 = vector.multi_reduction <add>, %15, %cst_4 [1, 2] : vector<1x8x32xf32> to vector<1xf32>
    %17 = vector.shape_cast %16 : vector<1xf32> to vector<1x1x1xf32>
    %18 = vector.extract %17[0, 0, 0] : f32 from vector<1x1x1xf32>
    %cst_5 = arith.constant 8.000000e+00 : f32
    %19 = arith.mulf %cst_5, %18 : f32
    %cst_6 = arith.constant 0.000000e+00 : f32
    %20 = arith.maximumf %19, %cst_6 : f32
    %21 = math.rsqrt %7 : f32
    %22 = arith.mulf %20, %21 : f32
    %cst_7 = arith.constant 0.0357142873 : f32
    %23 = arith.mulf %22, %cst_7 : f32
    %c0_8 = arith.constant 0 : index
    %c0_9 = arith.constant 0 : index
    %24 = memref.load %arg1[%c0_8, %c0_9] : memref<1x1xf32, #tpu.memory_space<smem>>
    memref.store %23, %arg1[%c0_8, %c0_9] : memref<1x1xf32, #tpu.memory_space<smem>>
    return
  }
}

</mosaic_0001>

<bundles_post_ra>
// kernel: tpu_custom_call.1
= control target key start
LH: loop header
LB: loop body
LE: loop exit
PB: predicated region body
PF: predicated region fallthrough
CT: control target
= control target key end

     0   :  { %6 = vsyncpa [#allocation3], 0  ;;  %s161_s0 = inlined_call_operand.hbm [shape: f32[8,32], index: 0, kind: input, shape index: {}]   ;;  %s162_s1 = inlined_call_operand.hbm [shape: f32[1,1], index: 1, kind: output, shape index: {}]  }
   0x1   :  { %7 = vsyncpa [#allocation4], 0  ;;  %s124_s6 = smov [#allocation2]   ;;  %s88_s10 = scalar_lea.hbm %s161_s0, 128 }
   0x2   :  { %s14_s7 = sshll.u32 %s124_s6, 4  ;;  %p89_p0 = scmp.ne.s32.totalorder %s161_s0, %s88_s10  ;;  %s15_s7 = int_to_ptr.vmem [resolvable:$true] %s14_s7 }
   0x3   :  { %p92_p1 = scmp.lt.u32.totalorder %s88_s10, %s161_s0 }
   0x5   :  { %p94_p2 = pnand %p92_p1, %p89_p0 }
   0x7   :  { %97 = shalt.err (!%p94_p2)
}
   0x8   :  { %s98_s15 = scalar_lea.vmem %s15_s7, 128  ;;  %p103_p4 = scmp.lt.s32.totalorder %s15_s7, %s15_s7 }
   0x9   :  { %p99_p3 = scmp.ne.s32.totalorder %s15_s7, %s98_s15  ;;  %p104_p5 = scmp.lt.s32.totalorder %s98_s15, %s98_s15 }
   0xb   :  { %p105_p6 = por %p104_p5, %p103_p4 }
   0xd   :  { %p106_p7 = pnand %p105_p6, %p99_p3 }
   0xf   :  { %109 = shalt.err (!%p106_p7)
}
  0x10   :  { %17 = dma.hbm_to_vmem [thread:$0]  %s161_s0, 128, %s15_s7, [#allocation3]  }
  0x11   :  { %120 = dma.done.wait [#allocation3], 128  }
  0x12   :  { %121 = vsyncadd [#allocation3], 4294967168  ;;  %v21_v0 = vld [vmem:[#allocation2] sm:$0xff]  ;;  %vm23_vm0 = vcmask 261120   ;;  %s125_s20 = smov 0.0   ;;  %s110_s27 = scalar_lea.hbm %s162_s1, 16 }
  0x13   :  { %v22_v1 = vmul.f32 %v21_v0, %v21_v0  ;;  %v34_v2 = vsel %vm23_vm0, %v21_v0, 0.0  ;;  %p111_p8 = scmp.ne.s32.totalorder %s162_s1, %s110_s27  ;;  %p114_p9 = scmp.lt.u32.totalorder %s110_s27, %s162_s1 }
  0x14   :  { %v35_v3 = vrot.slane %v34_v2, 4 }
  0x15   :  { %v24_v4 = vsel %vm23_vm0, %v22_v1, 0.0  ;;  %p116_p10 = pnand %p114_p9, %p111_p8 }
  0x16   :  { %v36_v5 = vadd.f32 %v35_v3, %v34_v2  ;;  %25 = vadd.xlane.f32.xlu0 %v24_v4 }
  0x18   :  { %v37_v6 = vrot.slane %v36_v5, 2 }
  0x1a   :  { %v38_v7 = vadd.f32 %v37_v6, %v36_v5 }
  0x1c   :  { %v39_v8 = vrot.slane %v38_v7, 1 }
  0x1e   :  { %v40_v9 = vadd.f32 %v39_v8, %v38_v7 }
  0x20   :  { %v41_v10 = vmul.f32 0.125, %v40_v9 }
  0x22   :  { %v42_v11 = vsub.f32 %v21_v0, %v41_v10 }
  0x24   :  { %v43_v12 = vmul.f32 %v42_v11, %v42_v11 }
  0x26   :  { %v44_v13 = vsel %vm23_vm0, %v43_v12, 0.0 }
  0x27   :  { %45 = vadd.xlane.f32.xlu0 %v44_v13 }
  0xa3   :  { %v26_v14 = vpop.xlane.xlu0 %25 }
  0xa4   :  { %v27_v15 = vrot.slane %v26_v14, 4 }
  0xa6   :  { %v28_v16 = vmax.f32 %v26_v14, %v27_v15 }
  0xa8   :  { %v29_v17 = vrot.slane %v28_v16, 2 }
  0xaa   :  { %v30_v18 = vmax.f32 %v28_v16, %v29_v17 }
  0xac   :  { %v31_v19 = vrot.slane %v30_v18, 1 }
  0xae   :  { %v32_v20 = vmax.f32 %v30_v18, %v31_v19 }
  0xb0   :  { %77 = vpush %v32_v20 }
  0xb4   :  { %v46_v21 = vpop.xlane.xlu0 %45 }
  0xb5   :  { %v47_v22 = vrot.slane %v46_v21, 4 }
  0xb7   :  { %v48_v23 = vadd.f32 %v47_v22, %v46_v21 }
  0xb9   :  { %v49_v24 = vrot.slane %v48_v23, 2 }
  0xbb   :  { %v50_v25 = vadd.f32 %v49_v24, %v48_v23 }
  0xbd   :  { %v51_v26 = vrot.slane %v50_v25, 1 }
  0xbf   :  { %v52_v27 = vadd.f32 %v51_v26, %v50_v25 }
  0xc1   :  { %79 = vpush %v52_v27 }
  0xe1   :  { %s78_s0 = spop %77 }
  0xe2   :  { %v56_v28 = vstv %s78_s0 }
  0xe3   :  { %86 = vrsqrt.f32 %v56_v28 }
  0xed   :  { %v87_v29 = vpop.eup %86 }
  0xee   :  { %81 = vpush %v87_v29 }
  0xf2   :  { %s80_s18 = spop %79 }
  0xf3   :  { %s54_s19 = smul.f32 8.0, %s80_s18 }
  0xf5   :  { %s55_s21 = smax.f32 %s125_s20, %s54_s19 }
 0x11f   :  { %s82_s22 = spop %81 }
 0x120   :  { %s59_s23 = smul.f32 %s82_s22, %s55_s21 }
 0x122   :  { %s60_s24 = smul.f32 0.035714287, %s59_s23 }
 0x124   :  { %62 = sst [smem:[#allocation5]] %s60_s24 }
 0x125   :  { %119 = shalt.err (!%p116_p10)
}
 0x126   :  { %s126_s3 = smov [#allocation5]  }
 0x127   :  { %70 = dma.smem_to_hbm %s126_s3, 16, %s162_s1, [#allocation4]  }
 0x128   :  { %122 = dma.done.wait [#allocation4], 16  }
 0x129   :  { %123 = vsyncadd [#allocation4], 4294967280 }
 0x12a   :  { %74 = sfence }
 0x12b   :  { %75 = vsyncpa [#allocation3], 1 }
 0x12c   :  { %76 = vsyncpa [#allocation4], 1 }

</bundles_post_ra>
